<compile_context>
chip_gen: v5e
topology: v5e:2x2
jax: 0.10.0
libtpu: 0.0.40
codegen_flags: <defaults>
</compile_context>

<pallas_src>
import functools

import jax
import jax.numpy as jnp
from jax.experimental import pallas as pl
from jax.experimental.pallas import tpu as pltpu


def _round_up(n, m):
    return ((n + m - 1) // m) * m


def _lstm_kernel(x_ref, lstm_ref, fc_ref, y_ref, hall_ref,
                 *, T, Bp, I, H, O, Ip, Hp):
    """Single invocation: whole sequence + params resident in VMEM.

    x_ref   : (T*Bp, I)        flattened, batch-padded, time-major inputs
    lstm_ref: (Ip+Hp+8, 4H)    packed [W_ih^T ; W_hh^T ; b_ih+b_hh] (8-row aligned sections)
    fc_ref  : (Hp+8, O)        packed [W_fc^T ; b_fc]
    y_ref   : (T*Bp, O)        output
    hall_ref: (T*Bp, H)        VMEM scratch collecting hidden states for the fc head
    """
    # (1) Input projection for ALL time steps in one MXU matmul (bias fused).
    x_proj = (jnp.dot(x_ref[...], lstm_ref[0:I, :],
                      preferred_element_type=jnp.float32)
              + lstm_ref[Ip + Hp:Ip + Hp + 1, :])              # (T*Bp, 4H)

    w_hh = lstm_ref[Ip:Ip + H, :]                              # (H, 4H), loaded once

    # (2) Sequential recurrence, fully unrolled; h/c live in vregs (loop carries).
    #     With Bp=8 every slice/store below is a whole sublane-aligned tile.
    h = jnp.zeros((Bp, H), jnp.float32)
    c = jnp.zeros((Bp, H), jnp.float32)
    for t in range(T):
        gates = x_proj[t * Bp:(t + 1) * Bp, :] + jnp.dot(
            h, w_hh, preferred_element_type=jnp.float32)       # (Bp, 4H), order i,f,g,o
        # One sigmoid + one tanh over the full gates vreg (2 EUP pushes/step instead
        # of 4); gate extraction is then cheap static lane slices of the results.
        sig = jax.nn.sigmoid(gates)                            # i, f, o live here
        tnh = jnp.tanh(gates)                                  # g lives here
        i_g = sig[:, 0 * H:1 * H]
        f_g = sig[:, 1 * H:2 * H]
        g_g = tnh[:, 2 * H:3 * H]
        o_g = sig[:, 3 * H:4 * H]
        c = f_g * c + i_g * g_g
        h = o_g * jnp.tanh(c)
        hall_ref[t * Bp:(t + 1) * Bp, :] = h                   # aligned (8, H) store

    # (3) fc head hoisted out of the time loop: one matmul, one dense store.
    #     O=16 keeps the output lane-sparse; at ~4 KB total this is negligible (kept
    #     as-is per review; revisit only if O grows toward 128+).
    y = (jnp.dot(hall_ref[...], fc_ref[0:H, :],
                 preferred_element_type=jnp.float32)
         + fc_ref[Hp:Hp + 1, :])                               # (T*Bp, O)
    y_ref[...] = y.astype(y_ref.dtype)


def pack_params(w_ih, w_hh, b_ih, b_hh, w_fc, b_fc):
    """Pack/transposes the parameters ONCE; the result is reused across forward calls.

    Returns (lstm_pack, fc_pack, dims) where
      lstm_pack: (Ip+Hp+8, 4H)  rows [0:I)=W_ih^T, [Ip:Ip+H)=W_hh^T, row Ip+Hp = b_ih+b_hh
      fc_pack  : (Hp+8, O)      rows [0:H)=W_fc^T, row Hp = b_fc
    """
    H = w_hh.shape[1]
    I = w_ih.shape[1]
    O = w_fc.shape[0]
    Ip = _round_up(I, 8)
    Hp = _round_up(H, 8)

    lstm_pack = jnp.zeros((Ip + Hp + 8, 4 * H), jnp.float32)
    lstm_pack = lstm_pack.at[:I, :].set(jnp.transpose(w_ih).astype(jnp.float32))
    lstm_pack = lstm_pack.at[Ip:Ip + H, :].set(jnp.transpose(w_hh).astype(jnp.float32))
    lstm_pack = lstm_pack.at[Ip + Hp, :].set((b_ih + b_hh).astype(jnp.float32))

    fc_pack = jnp.zeros((Hp + 8, O), jnp.float32)
    fc_pack = fc_pack.at[:H, :].set(jnp.transpose(w_fc).astype(jnp.float32))
    fc_pack = fc_pack.at[Hp, :].set(b_fc.astype(jnp.float32))

    dims = dict(I=I, H=H, O=O, Ip=Ip, Hp=Hp)
    return lstm_pack, fc_pack, dims


def lstm_model_forward(inputs, packed):
    """inputs: (T, B, I). packed: output of pack_params. Returns (T, B, O)."""
    lstm_pack, fc_pack, dims = packed
    T, B, I = inputs.shape
    H, O, Ip, Hp = dims["H"], dims["O"], dims["Ip"], dims["Hp"]
    assert dims["I"] == I

    # Pad batch to the f32 sublane tile so every in-kernel per-step tensor is aligned.
    Bp = _round_up(max(B, 8), 8)

    # Guard the single-block (no-grid) design: everything stays resident in VMEM.
    # ~ (I + 4H + H + O) * 4 bytes per (t, b) row; fall back to a chunked-T grid with a
    # resident h/c accumulator ("arbitrary" axis) well before the scoped-VMEM limit
    # (32 MiB default; v7x physical ceiling 64 MiB).
    work_bytes = T * Bp * (I + 4 * H + H + O) * 4
    assert work_bytes < (16 << 20), (
        "sequence too large for the single-block kernel; use a chunked-T grid")

    # Note: compute is f32 internally; output dtype follows the input dtype (a bf16
    # input would produce a bf16 output by design).
    x_p = jnp.zeros((T, Bp, I), jnp.float32).at[:, :B, :].set(
        inputs.astype(jnp.float32))
    x2d = x_p.reshape(T * Bp, I)

    kernel = functools.partial(_lstm_kernel, T=T, Bp=Bp, I=I, H=H, O=O, Ip=Ip, Hp=Hp)
    vmem = pltpu.MemorySpace.VMEM

    y2d = pl.pallas_call(
        kernel,
        out_shape=jax.ShapeDtypeStruct((T * Bp, O), inputs.dtype),
        in_specs=[
            pl.BlockSpec(memory_space=vmem),     # x (flattened, batch-padded)
            pl.BlockSpec(memory_space=vmem),     # packed LSTM params
            pl.BlockSpec(memory_space=vmem),     # packed fc params
        ],
        out_specs=pl.BlockSpec(memory_space=vmem),
        scratch_shapes=[pltpu.VMEM((T * Bp, H), jnp.float32)],  # hidden-state buffer
    )(x2d, lstm_pack, fc_pack)

    return y2d.reshape(T, Bp, O)[:, :B, :]


def reference_forward(inputs, w_ih, w_hh, b_ih, b_hh, w_fc, b_fc):
    """Pure-JAX reference (matches torch.nn.LSTMCell + Linear in eval mode)."""
    H = w_hh.shape[1]

    def step(carry, x):
        h, c = carry
        gates = x @ w_ih.T + b_ih + h @ w_hh.T + b_hh
        i = jax.nn.sigmoid(gates[:, 0 * H:1 * H])
        f = jax.nn.sigmoid(gates[:, 1 * H:2 * H])
        g = jnp.tanh(gates[:, 2 * H:3 * H])
        o = jax.nn.sigmoid(gates[:, 3 * H:4 * H])
        c_new = f * c + i * g
        h_new = o * jnp.tanh(c_new)
        y = h_new @ w_fc.T + b_fc
        return (h_new, c_new), y

    B = inputs.shape[1]
    h0 = jnp.zeros((B, H), jnp.float32)
    c0 = jnp.zeros((B, H), jnp.float32)
    _, ys = jax.lax.scan(step, (h0, c0), inputs)
    return ys


if __name__ == "__main__":
    # Model config (hidden_size defaults to input_size // 2 in the module)
    input_size = 64
    hidden_size = input_size // 2   # 32
    output_size = 16
    T, B = 8, 2

    key = jax.random.PRNGKey(0)
    k_x, k1, k2, k3, k4, k5, k6 = jax.random.split(key, 7)

    inputs = jax.random.normal(k_x, (T, B, input_size), dtype=jnp.float32)

    # Deterministic parameter init (uniform, roughly PyTorch's 1/sqrt(H) scaling)
    s = 1.0 / jnp.sqrt(hidden_size)
    w_ih = jax.random.uniform(k1, (4 * hidden_size, input_size), minval=-s, maxval=s)
    w_hh = jax.random.uniform(k2, (4 * hidden_size, hidden_size), minval=-s, maxval=s)
    b_ih = jax.random.uniform(k3, (4 * hidden_size,), minval=-s, maxval=s)
    b_hh = jax.random.uniform(k4, (4 * hidden_size,), minval=-s, maxval=s)
    w_fc = jax.random.uniform(k5, (output_size, hidden_size), minval=-s, maxval=s)
    b_fc = jax.random.uniform(k6, (output_size,), minval=-s, maxval=s)

    # Params are packed once and reused across calls (per perf review).
    packed = pack_params(w_ih, w_hh, b_ih, b_hh, w_fc, b_fc)
    packed = jax.block_until_ready(packed)

    out = lstm_model_forward(inputs, packed)
    out = jax.block_until_ready(out)

    ref = reference_forward(inputs, w_ih, w_hh, b_ih, b_hh, w_fc, b_fc)
    assert out.shape == (T, B, output_size)
    assert jnp.allclose(out, ref, atol=1e-5, rtol=1e-5), "mismatch vs JAX reference"

    print("KERNEL_OK")
</pallas_src>

<mosaic_0001>
module attributes {stable_mosaic.version = 11 : i64} {
  func.func @_lstm_kernel(%arg0: memref<64x64xf32, #tpu.memory_space<vmem>>, %arg1: memref<104x128xf32, #tpu.memory_space<vmem>>, %arg2: memref<40x16xf32, #tpu.memory_space<vmem>>, %arg3: memref<64x16xf32, #tpu.memory_space<vmem>>, %arg4: memref<64x32xf32, #tpu.memory_space<vmem>>) attributes {dimension_semantics = [], scalar_prefetch = 0 : i64, scratch_operands = 1 : i64, tpu.core_type = #tpu.core_type<tc>} {
    %c0 = arith.constant 0 : index
    %c0_0 = arith.constant 0 : index
    %0 = vector.load %arg0[%c0, %c0_0] : memref<64x64xf32, #tpu.memory_space<vmem>>, vector<64x64xf32>
    %c0_1 = arith.constant 0 : index
    %c0_2 = arith.constant 0 : index
    %1 = vector.load %arg1[%c0_1, %c0_2] : memref<104x128xf32, #tpu.memory_space<vmem>>, vector<64x128xf32>
    %cst = arith.constant dense<0.000000e+00> : vector<64x128xf32>
    %2 = tpu.matmul %0, %1, %cst {dimension_numbers = #tpu.dot_dimension_numbers<[1], [0], [0], [1], [0, 0, 1, 1], [], []>} : vector<64x64xf32>, vector<64x128xf32>, vector<64x128xf32> -> vector<64x128xf32>
    %c96 = arith.constant 96 : index
    %c0_3 = arith.constant 0 : index
    %3 = vector.load %arg1[%c96, %c0_3] : memref<104x128xf32, #tpu.memory_space<vmem>>, vector<1x128xf32>
    %4 = vector.broadcast %3 : vector<1x128xf32> to vector<64x128xf32>
    %5 = arith.addf %2, %4 : vector<64x128xf32>
    %c64 = arith.constant 64 : index
    %c0_4 = arith.constant 0 : index
    %6 = vector.load %arg1[%c64, %c0_4] : memref<104x128xf32, #tpu.memory_space<vmem>>, vector<32x128xf32>
    %cst_5 = arith.constant 0.000000e+00 : f32
    %7 = vector.broadcast %cst_5 : f32 to vector<8x32xf32>
    %cst_6 = arith.constant 0.000000e+00 : f32
    %8 = vector.broadcast %cst_6 : f32 to vector<8x32xf32>
    %9 = vector.extract_strided_slice %5 {offsets = [0, 0], sizes = [8, 128], strides = [1, 1]} : vector<64x128xf32> to vector<8x128xf32>
    %cst_7 = arith.constant dense<0.000000e+00> : vector<8x128xf32>
    %10 = tpu.matmul %7, %6, %cst_7 {dimension_numbers = #tpu.dot_dimension_numbers<[1], [0], [0], [1], [0, 0, 1, 1], [], []>} : vector<8x32xf32>, vector<32x128xf32>, vector<8x128xf32> -> vector<8x128xf32>
    %11 = arith.addf %9, %10 : vector<8x128xf32>
    %12 = arith.negf %11 : vector<8x128xf32>
    %13 = math.exp %12 : vector<8x128xf32>
    %cst_8 = arith.constant 1.000000e+00 : f32
    %14 = vector.broadcast %cst_8 : f32 to vector<8x128xf32>
    %15 = arith.addf %14, %13 : vector<8x128xf32>
    %16 = arith.divf %14, %15 : vector<8x128xf32>
    %17 = math.tanh %11 : vector<8x128xf32>
    %18 = vector.extract_strided_slice %16 {offsets = [0, 0], sizes = [8, 32], strides = [1, 1]} : vector<8x128xf32> to vector<8x32xf32>
    %19 = vector.extract_strided_slice %16 {offsets = [0, 32], sizes = [8, 32], strides = [1, 1]} : vector<8x128xf32> to vector<8x32xf32>
    %20 = vector.extract_strided_slice %17 {offsets = [0, 64], sizes = [8, 32], strides = [1, 1]} : vector<8x128xf32> to vector<8x32xf32>
    %21 = vector.extract_strided_slice %16 {offsets = [0, 96], sizes = [8, 32], strides = [1, 1]} : vector<8x128xf32> to vector<8x32xf32>
    %22 = arith.mulf %19, %8 : vector<8x32xf32>
    %23 = arith.mulf %18, %20 : vector<8x32xf32>
    %24 = arith.addf %22, %23 : vector<8x32xf32>
    %25 = math.tanh %24 : vector<8x32xf32>
    %26 = arith.mulf %21, %25 : vector<8x32xf32>
    %c0_9 = arith.constant 0 : index
    %c0_10 = arith.constant 0 : index
    %27 = vector.load %arg4[%c0_9, %c0_10] : memref<64x32xf32, #tpu.memory_space<vmem>>, vector<8x32xf32>
    tpu.vector_store %arg4[%c0_9, %c0_10], %26 {strides = array<i32>} : memref<64x32xf32, #tpu.memory_space<vmem>>, vector<8x32xf32>,
    %28 = vector.extract_strided_slice %5 {offsets = [8, 0], sizes = [8, 128], strides = [1, 1]} : vector<64x128xf32> to vector<8x128xf32>
    %cst_11 = arith.constant dense<0.000000e+00> : vector<8x128xf32>
    %29 = tpu.matmul %26, %6, %cst_11 {dimension_numbers = #tpu.dot_dimension_numbers<[1], [0], [0], [1], [0, 0, 1, 1], [], []>} : vector<8x32xf32>, vector<32x128xf32>, vector<8x128xf32> -> vector<8x128xf32>
    %30 = arith.addf %28, %29 : vector<8x128xf32>
    %31 = arith.negf %30 : vector<8x128xf32>
    %32 = math.exp %31 : vector<8x128xf32>
    %cst_12 = arith.constant 1.000000e+00 : f32
    %33 = vector.broadcast %cst_12 : f32 to vector<8x128xf32>
    %34 = arith.addf %33, %32 : vector<8x128xf32>
    %35 = arith.divf %33, %34 : vector<8x128xf32>
    %36 = math.tanh %30 : vector<8x128xf32>
    %37 = vector.extract_strided_slice %35 {offsets = [0, 0], sizes = [8, 32], strides = [1, 1]} : vector<8x128xf32> to vector<8x32xf32>
    %38 = vector.extract_strided_slice %35 {offsets = [0, 32], sizes = [8, 32], strides = [1, 1]} : vector<8x128xf32> to vector<8x32xf32>
    %39 = vector.extract_strided_slice %36 {offsets = [0, 64], sizes = [8, 32], strides = [1, 1]} : vector<8x128xf32> to vector<8x32xf32>
    %40 = vector.extract_strided_slice %35 {offsets = [0, 96], sizes = [8, 32], strides = [1, 1]} : vector<8x128xf32> to vector<8x32xf32>
    %41 = arith.mulf %38, %24 : vector<8x32xf32>
    %42 = arith.mulf %37, %39 : vector<8x32xf32>
    %43 = arith.addf %41, %42 : vector<8x32xf32>
    %44 = math.tanh %43 : vector<8x32xf32>
    %45 = arith.mulf %40, %44 : vector<8x32xf32>
    %c8 = arith.constant 8 : index
    %c0_13 = arith.constant 0 : index
    %46 = vector.load %arg4[%c8, %c0_13] : memref<64x32xf32, #tpu.memory_space<vmem>>, vector<8x32xf32>
    tpu.vector_store %arg4[%c8, %c0_13], %45 {strides = array<i32>} : memref<64x32xf32, #tpu.memory_space<vmem>>, vector<8x32xf32>,
    %47 = vector.extract_strided_slice %5 {offsets = [16, 0], sizes = [8, 128], strides = [1, 1]} : vector<64x128xf32> to vector<8x128xf32>
    %cst_14 = arith.constant dense<0.000000e+00> : vector<8x128xf32>
    %48 = tpu.matmul %45, %6, %cst_14 {dimension_numbers = #tpu.dot_dimension_numbers<[1], [0], [0], [1], [0, 0, 1, 1], [], []>} : vector<8x32xf32>, vector<32x128xf32>, vector<8x128xf32> -> vector<8x128xf32>
    %49 = arith.addf %47, %48 : vector<8x128xf32>
    %50 = arith.negf %49 : vector<8x128xf32>
    %51 = math.exp %50 : vector<8x128xf32>
    %cst_15 = arith.constant 1.000000e+00 : f32
    %52 = vector.broadcast %cst_15 : f32 to vector<8x128xf32>
    %53 = arith.addf %52, %51 : vector<8x128xf32>
    %54 = arith.divf %52, %53 : vector<8x128xf32>
    %55 = math.tanh %49 : vector<8x128xf32>
    %56 = vector.extract_strided_slice %54 {offsets = [0, 0], sizes = [8, 32], strides = [1, 1]} : vector<8x128xf32> to vector<8x32xf32>
    %57 = vector.extract_strided_slice %54 {offsets = [0, 32], sizes = [8, 32], strides = [1, 1]} : vector<8x128xf32> to vector<8x32xf32>
    %58 = vector.extract_strided_slice %55 {offsets = [0, 64], sizes = [8, 32], strides = [1, 1]} : vector<8x128xf32> to vector<8x32xf32>
    %59 = vector.extract_strided_slice %54 {offsets = [0, 96], sizes = [8, 32], strides = [1, 1]} : vector<8x128xf32> to vector<8x32xf32>
    %60 = arith.mulf %57, %43 : vector<8x32xf32>
    %61 = arith.mulf %56, %58 : vector<8x32xf32>
    %62 = arith.addf %60, %61 : vector<8x32xf32>
    %63 = math.tanh %62 : vector<8x32xf32>
    %64 = arith.mulf %59, %63 : vector<8x32xf32>
    %c16 = arith.constant 16 : index
    %c0_16 = arith.constant 0 : index
    %65 = vector.load %arg4[%c16, %c0_16] : memref<64x32xf32, #tpu.memory_space<vmem>>, vector<8x32xf32>
    tpu.vector_store %arg4[%c16, %c0_16], %64 {strides = array<i32>} : memref<64x32xf32, #tpu.memory_space<vmem>>, vector<8x32xf32>,
    %66 = vector.extract_strided_slice %5 {offsets = [24, 0], sizes = [8, 128], strides = [1, 1]} : vector<64x128xf32> to vector<8x128xf32>
    %cst_17 = arith.constant dense<0.000000e+00> : vector<8x128xf32>
    %67 = tpu.matmul %64, %6, %cst_17 {dimension_numbers = #tpu.dot_dimension_numbers<[1], [0], [0], [1], [0, 0, 1, 1], [], []>} : vector<8x32xf32>, vector<32x128xf32>, vector<8x128xf32> -> vector<8x128xf32>
    %68 = arith.addf %66, %67 : vector<8x128xf32>
    %69 = arith.negf %68 : vector<8x128xf32>
    %70 = math.exp %69 : vector<8x128xf32>
    %cst_18 = arith.constant 1.000000e+00 : f32
    %71 = vector.broadcast %cst_18 : f32 to vector<8x128xf32>
    %72 = arith.addf %71, %70 : vector<8x128xf32>
    %73 = arith.divf %71, %72 : vector<8x128xf32>
    %74 = math.tanh %68 : vector<8x128xf32>
    %75 = vector.extract_strided_slice %73 {offsets = [0, 0], sizes = [8, 32], strides = [1, 1]} : vector<8x128xf32> to vector<8x32xf32>
    %76 = vector.extract_strided_slice %73 {offsets = [0, 32], sizes = [8, 32], strides = [1, 1]} : vector<8x128xf32> to vector<8x32xf32>
    %77 = vector.extract_strided_slice %74 {offsets = [0, 64], sizes = [8, 32], strides = [1, 1]} : vector<8x128xf32> to vector<8x32xf32>
    %78 = vector.extract_strided_slice %73 {offsets = [0, 96], sizes = [8, 32], strides = [1, 1]} : vector<8x128xf32> to vector<8x32xf32>
    %79 = arith.mulf %76, %62 : vector<8x32xf32>
    %80 = arith.mulf %75, %77 : vector<8x32xf32>
    %81 = arith.addf %79, %80 : vector<8x32xf32>
    %82 = math.tanh %81 : vector<8x32xf32>
    %83 = arith.mulf %78, %82 : vector<8x32xf32>
    %c24 = arith.constant 24 : index
    %c0_19 = arith.constant 0 : index
    %84 = vector.load %arg4[%c24, %c0_19] : memref<64x32xf32, #tpu.memory_space<vmem>>, vector<8x32xf32>
    tpu.vector_store %arg4[%c24, %c0_19], %83 {strides = array<i32>} : memref<64x32xf32, #tpu.memory_space<vmem>>, vector<8x32xf32>,
    %85 = vector.extract_strided_slice %5 {offsets = [32, 0], sizes = [8, 128], strides = [1, 1]} : vector<64x128xf32> to vector<8x128xf32>
    %cst_20 = arith.constant dense<0.000000e+00> : vector<8x128xf32>
    %86 = tpu.matmul %83, %6, %cst_20 {dimension_numbers = #tpu.dot_dimension_numbers<[1], [0], [0], [1], [0, 0, 1, 1], [], []>} : vector<8x32xf32>, vector<32x128xf32>, vector<8x128xf32> -> vector<8x128xf32>
    %87 = arith.addf %85, %86 : vector<8x128xf32>
    %88 = arith.negf %87 : vector<8x128xf32>
    %89 = math.exp %88 : vector<8x128xf32>
    %cst_21 = arith.constant 1.000000e+00 : f32
    %90 = vector.broadcast %cst_21 : f32 to vector<8x128xf32>
    %91 = arith.addf %90, %89 : vector<8x128xf32>
    %92 = arith.divf %90, %91 : vector<8x128xf32>
    %93 = math.tanh %87 : vector<8x128xf32>
    %94 = vector.extract_strided_slice %92 {offsets = [0, 0], sizes = [8, 32], strides = [1, 1]} : vector<8x128xf32> to vector<8x32xf32>
    %95 = vector.extract_strided_slice %92 {offsets = [0, 32], sizes = [8, 32], strides = [1, 1]} : vector<8x128xf32> to vector<8x32xf32>
    %96 = vector.extract_strided_slice %93 {offsets = [0, 64], sizes = [8, 32], strides = [1, 1]} : vector<8x128xf32> to vector<8x32xf32>
    %97 = vector.extract_strided_slice %92 {offsets = [0, 96], sizes = [8, 32], strides = [1, 1]} : vector<8x128xf32> to vector<8x32xf32>
    %98 = arith.mulf %95, %81 : vector<8x32xf32>
    %99 = arith.mulf %94, %96 : vector<8x32xf32>
    %100 = arith.addf %98, %99 : vector<8x32xf32>
    %101 = math.tanh %100 : vector<8x32xf32>
    %102 = arith.mulf %97, %101 : vector<8x32xf32>
    %c32 = arith.constant 32 : index
    %c0_22 = arith.constant 0 : index
    %103 = vector.load %arg4[%c32, %c0_22] : memref<64x32xf32, #tpu.memory_space<vmem>>, vector<8x32xf32>
    tpu.vector_store %arg4[%c32, %c0_22], %102 {strides = array<i32>} : memref<64x32xf32, #tpu.memory_space<vmem>>, vector<8x32xf32>,
    %104 = vector.extract_strided_slice %5 {offsets = [40, 0], sizes = [8, 128], strides = [1, 1]} : vector<64x128xf32> to vector<8x128xf32>
    %cst_23 = arith.constant dense<0.000000e+00> : vector<8x128xf32>
    %105 = tpu.matmul %102, %6, %cst_23 {dimension_numbers = #tpu.dot_dimension_numbers<[1], [0], [0], [1], [0, 0, 1, 1], [], []>} : vector<8x32xf32>, vector<32x128xf32>, vector<8x128xf32> -> vector<8x128xf32>
    %106 = arith.addf %104, %105 : vector<8x128xf32>
    %107 = arith.negf %106 : vector<8x128xf32>
    %108 = math.exp %107 : vector<8x128xf32>
    %cst_24 = arith.constant 1.000000e+00 : f32
    %109 = vector.broadcast %cst_24 : f32 to vector<8x128xf32>
    %110 = arith.addf %109, %108 : vector<8x128xf32>
    %111 = arith.divf %109, %110 : vector<8x128xf32>
    %112 = math.tanh %106 : vector<8x128xf32>
    %113 = vector.extract_strided_slice %111 {offsets = [0, 0], sizes = [8, 32], strides = [1, 1]} : vector<8x128xf32> to vector<8x32xf32>
    %114 = vector.extract_strided_slice %111 {offsets = [0, 32], sizes = [8, 32], strides = [1, 1]} : vector<8x128xf32> to vector<8x32xf32>
    %115 = vector.extract_strided_slice %112 {offsets = [0, 64], sizes = [8, 32], strides = [1, 1]} : vector<8x128xf32> to vector<8x32xf32>
    %116 = vector.extract_strided_slice %111 {offsets = [0, 96], sizes = [8, 32], strides = [1, 1]} : vector<8x128xf32> to vector<8x32xf32>
    %117 = arith.mulf %114, %100 : vector<8x32xf32>
    %118 = arith.mulf %113, %115 : vector<8x32xf32>
    %119 = arith.addf %117, %118 : vector<8x32xf32>
    %120 = math.tanh %119 : vector<8x32xf32>
    %121 = arith.mulf %116, %120 : vector<8x32xf32>
    %c40 = arith.constant 40 : index
    %c0_25 = arith.constant 0 : index
    %122 = vector.load %arg4[%c40, %c0_25] : memref<64x32xf32, #tpu.memory_space<vmem>>, vector<8x32xf32>
    tpu.vector_store %arg4[%c40, %c0_25], %121 {strides = array<i32>} : memref<64x32xf32, #tpu.memory_space<vmem>>, vector<8x32xf32>,
    %123 = vector.extract_strided_slice %5 {offsets = [48, 0], sizes = [8, 128], strides = [1, 1]} : vector<64x128xf32> to vector<8x128xf32>
    %cst_26 = arith.constant dense<0.000000e+00> : vector<8x128xf32>
    %124 = tpu.matmul %121, %6, %cst_26 {dimension_numbers = #tpu.dot_dimension_numbers<[1], [0], [0], [1], [0, 0, 1, 1], [], []>} : vector<8x32xf32>, vector<32x128xf32>, vector<8x128xf32> -> vector<8x128xf32>
    %125 = arith.addf %123, %124 : vector<8x128xf32>
    %126 = arith.negf %125 : vector<8x128xf32>
    %127 = math.exp %126 : vector<8x128xf32>
    %cst_27 = arith.constant 1.000000e+00 : f32
    %128 = vector.broadcast %cst_27 : f32 to vector<8x128xf32>
    %129 = arith.addf %128, %127 : vector<8x128xf32>
    %130 = arith.divf %128, %129 : vector<8x128xf32>
    %131 = math.tanh %125 : vector<8x128xf32>
    %132 = vector.extract_strided_slice %130 {offsets = [0, 0], sizes = [8, 32], strides = [1, 1]} : vector<8x128xf32> to vector<8x32xf32>
    %133 = vector.extract_strided_slice %130 {offsets = [0, 32], sizes = [8, 32], strides = [1, 1]} : vector<8x128xf32> to vector<8x32xf32>
    %134 = vector.extract_strided_slice %131 {offsets = [0, 64], sizes = [8, 32], strides = [1, 1]} : vector<8x128xf32> to vector<8x32xf32>
    %135 = vector.extract_strided_slice %130 {offsets = [0, 96], sizes = [8, 32], strides = [1, 1]} : vector<8x128xf32> to vector<8x32xf32>
    %136 = arith.mulf %133, %119 : vector<8x32xf32>
    %137 = arith.mulf %132, %134 : vector<8x32xf32>
    %138 = arith.addf %136, %137 : vector<8x32xf32>
    %139 = math.tanh %138 : vector<8x32xf32>
    %140 = arith.mulf %135, %139 : vector<8x32xf32>
    %c48 = arith.constant 48 : index
    %c0_28 = arith.constant 0 : index
    %141 = vector.load %arg4[%c48, %c0_28] : memref<64x32xf32, #tpu.memory_space<vmem>>, vector<8x32xf32>
    tpu.vector_store %arg4[%c48, %c0_28], %140 {strides = array<i32>} : memref<64x32xf32, #tpu.memory_space<vmem>>, vector<8x32xf32>,
    %142 = vector.extract_strided_slice %5 {offsets = [56, 0], sizes = [8, 128], strides = [1, 1]} : vector<64x128xf32> to vector<8x128xf32>
    %cst_29 = arith.constant dense<0.000000e+00> : vector<8x128xf32>
    %143 = tpu.matmul %140, %6, %cst_29 {dimension_numbers = #tpu.dot_dimension_numbers<[1], [0], [0], [1], [0, 0, 1, 1], [], []>} : vector<8x32xf32>, vector<32x128xf32>, vector<8x128xf32> -> vector<8x128xf32>
    %144 = arith.addf %142, %143 : vector<8x128xf32>
    %145 = arith.negf %144 : vector<8x128xf32>
    %146 = math.exp %145 : vector<8x128xf32>
    %cst_30 = arith.constant 1.000000e+00 : f32
    %147 = vector.broadcast %cst_30 : f32 to vector<8x128xf32>
    %148 = arith.addf %147, %146 : vector<8x128xf32>
    %149 = arith.divf %147, %148 : vector<8x128xf32>
    %150 = math.tanh %144 : vector<8x128xf32>
    %151 = vector.extract_strided_slice %149 {offsets = [0, 0], sizes = [8, 32], strides = [1, 1]} : vector<8x128xf32> to vector<8x32xf32>
    %152 = vector.extract_strided_slice %149 {offsets = [0, 32], sizes = [8, 32], strides = [1, 1]} : vector<8x128xf32> to vector<8x32xf32>
    %153 = vector.extract_strided_slice %150 {offsets = [0, 64], sizes = [8, 32], strides = [1, 1]} : vector<8x128xf32> to vector<8x32xf32>
    %154 = vector.extract_strided_slice %149 {offsets = [0, 96], sizes = [8, 32], strides = [1, 1]} : vector<8x128xf32> to vector<8x32xf32>
    %155 = arith.mulf %152, %138 : vector<8x32xf32>
    %156 = arith.mulf %151, %153 : vector<8x32xf32>
    %157 = arith.addf %155, %156 : vector<8x32xf32>
    %158 = math.tanh %157 : vector<8x32xf32>
    %159 = arith.mulf %154, %158 : vector<8x32xf32>
    %c56 = arith.constant 56 : index
    %c0_31 = arith.constant 0 : index
    %160 = vector.load %arg4[%c56, %c0_31] : memref<64x32xf32, #tpu.memory_space<vmem>>, vector<8x32xf32>
    tpu.vector_store %arg4[%c56, %c0_31], %159 {strides = array<i32>} : memref<64x32xf32, #tpu.memory_space<vmem>>, vector<8x32xf32>,
    %c0_32 = arith.constant 0 : index
    %c0_33 = arith.constant 0 : index
    %161 = vector.load %arg4[%c0_32, %c0_33] : memref<64x32xf32, #tpu.memory_space<vmem>>, vector<64x32xf32>
    %c0_34 = arith.constant 0 : index
    %c0_35 = arith.constant 0 : index
    %162 = vector.load %arg2[%c0_34, %c0_35] : memref<40x16xf32, #tpu.memory_space<vmem>>, vector<32x16xf32>
    %cst_36 = arith.constant dense<0.000000e+00> : vector<64x16xf32>
    %163 = tpu.matmul %161, %162, %cst_36 {dimension_numbers = #tpu.dot_dimension_numbers<[1], [0], [0], [1], [0, 0, 1, 1], [], []>} : vector<64x32xf32>, vector<32x16xf32>, vector<64x16xf32> -> vector<64x16xf32>
    %c32_37 = arith.constant 32 : index
    %c0_38 = arith.constant 0 : index
    %164 = vector.load %arg2[%c32_37, %c0_38] : memref<40x16xf32, #tpu.memory_space<vmem>>, vector<1x16xf32>
    %165 = vector.broadcast %164 : vector<1x16xf32> to vector<64x16xf32>
    %166 = arith.addf %163, %165 : vector<64x16xf32>
    %c0_39 = arith.constant 0 : index
    %c0_40 = arith.constant 0 : index
    %167 = vector.load %arg3[%c0_39, %c0_40] : memref<64x16xf32, #tpu.memory_space<vmem>>, vector<64x16xf32>
    tpu.vector_store %arg3[%c0_39, %c0_40], %166 {strides = array<i32>} : memref<64x16xf32, #tpu.memory_space<vmem>>, vector<64x16xf32>,
    return
  }
}

</mosaic_0001>

<bundles_post_ra>
// kernel: tpu_custom_call.1
= control target key start
LH: loop header
LB: loop body
LE: loop exit
PB: predicated region body
PF: predicated region fallthrough
CT: control target
= control target key end

     0   :  { %8 = vsyncpa [#allocation4], 0  ;;  %s1131_s0 = inlined_call_operand.hbm [shape: f32[64,64], index: 0, kind: input, shape index: {}]   ;;  %s1132_s1 = inlined_call_operand.hbm [shape: f32[104,128], index: 1, kind: input, shape index: {}]   ;;  %s1133_s2 = inlined_call_operand.vmem [shape: f32[40,16], index: 2, kind: input, shape index: {}]   ;;  %s1134_s3 = inlined_call_operand.vmem [shape: f32[64,16], index: 3, kind: output, shape index: {}]  }
   0x1   :  { %s14_s14 = sshll.u32 %s1131_s0, 4  ;;  %s15_s14 = int_to_ptr.hbm [resolvable:$true] %s14_s14 }
   0x2   :  { %9 = vsyncpa [#allocation6], 0  ;;  %s918_s15 = smov [#allocation3]   ;;  %s27_s19 = sshll.u32 %s1132_s1, 4  ;;  %s28_s19 = int_to_ptr.hbm [resolvable:$true] %s27_s19 }
   0x3   :  { %s16_s16 = sshll.u32 %s918_s15, 4  ;;  %s919_s20 = smov 128   ;;  %s17_s16 = int_to_ptr.vmem [resolvable:$true] %s16_s16 }
   0x4   :  { %s920_s21 = smov 8   ;;  %s921_s22 = smov [#allocation5]  }
   0x5   :  { %22 = dma.hbm_to_vmem [thread:$0]  %s15_s14, 1024, %s17_s16, [#allocation4], %s919_s20, %s919_s20, %s920_s21  }
   0x6   :  { %s29_s23 = sshll.u32 %s921_s22, 4  ;;  %s30_s23 = int_to_ptr.vmem [resolvable:$true] %s29_s23 }
   0x7   :  { %35 = dma.hbm_to_vmem [thread:$0]  %s28_s19, 1664, %s30_s23, [#allocation6], %s919_s20, %s919_s20, %s920_s21  }
   0x8   :  { %914 = dma.done.wait [#allocation4], 1024  }
   0x9   :  { %915 = vsyncadd [#allocation4], 4294966272 }
   0xa   :  { %916 = dma.done.wait [#allocation6], 1664  }
   0xb   :  { %917 = vsyncadd [#allocation6], 4294965632  ;;  %v61_v0 = vld [vmem:[#allocation5 + $0x38] sm:$0xff]  ;;  %v60_v1 = vld [vmem:[#allocation5 + $0x30] sm:$0xff]  ;;  %v922_v11 = vmov 0.0   ;;  %vm64_vm0 = vcmask 523264  }
   0xc   :  { %97 = vmatpush.msra.mxu0 %v61_v0  ;;  %781 = vmatpush.msra.mxu2 %v61_v0  ;;  %v59_v2 = vld [vmem:[#allocation5 + $0x28] sm:$0xff]  ;;  %v951_v3 = vld [vmem:[#allocation5 + $0x58] sm:$0xff]  ;;  %v953_v4 = vld [vmem:[#allocation5 + $0x50] sm:$0xff]  ;;  %s923_s0 = smov 64   ;;  %s924_s1 = smov 32   ;;  %vm134_vm5 = vcmask 261120  }
   0xd   :  { %150 = vmatpush.msra.mxu1 %v951_v3  ;;  %v58_v5 = vld [vmem:[#allocation5 + $0x20] sm:$0xff]  ;;  %v956_v6 = vld [vmem:[#allocation5 + $0x48] sm:$0xff]  ;;  %280 = vmatpush.msra.mxu3 %v951_v3  ;;  %v57_v7 = vld [vmem:[#allocation5 + $0x18] sm:$0xff] }
   0xe   :  { %98 = vmatpush.msra.mxu0 %v60_v1  ;;  %782 = vmatpush.msra.mxu2 %v60_v1  ;;  %v960_v8 = vld [vmem:[#allocation5 + $0x40] sm:$0xff]  ;;  %v56_v9 = vld [vmem:[#allocation5 + $0x10] sm:$0xff]  ;;  %v55_v10 = vld [vmem:[#allocation5 + $0x8] sm:$0xff] }
   0xf   :  { %151 = vmatpush.msra.mxu1 %v953_v4  ;;  %281 = vmatpush.msra.mxu3 %v953_v4  ;;  %v54_v12 = vld [vmem:[#allocation5] sm:$0xff]  ;;  %v52_v39 = vld [vmem:[#allocation3 + $0x30] sm:$0xff]  ;;  %v53_v40 = vld [vmem:[#allocation3 + $0x38] sm:$0xff] }
  0x10   :  { %99 = vmatpush.msra.mxu0 %v59_v2  ;;  %783 = vmatpush.msra.mxu2 %v59_v2  ;;  %v46_v13 = vld [vmem:[#allocation3] sm:$0xff]  ;;  %v47_v43 = vld [vmem:[#allocation3 + $0x8] sm:$0xff] }
  0x11   :  { %152 = vmatpush.msra.mxu1 %v956_v6  ;;  %282 = vmatpush.msra.mxu3 %v956_v6  ;;  %v984_v14 = vld [vmem:[#allocation5 + $0x60] ss:$0 sm:$0xff] }
  0x12   :  { %100 = vmatpush.msra.mxu0 %v58_v5  ;;  %784 = vmatpush.msra.mxu2 %v58_v5 }
  0x13   :  { %153 = vmatpush.msra.mxu1 %v960_v8  ;;  %283 = vmatpush.msra.mxu3 %v960_v8 }
  0x14   :  { %101 = vmatpush.msra.mxu0 %v57_v7  ;;  %154 = vmatmul.f32.vlgmr.msra.gmra.mxu1 %v922_v11 }
  0x15   :  { %785 = vmatpush.msra.mxu2 %v57_v7  ;;  %345 = vmatpush.msrb.mxu1 %v951_v3 }
  0x16   :  { %102 = vmatpush.msra.mxu0 %v56_v9  ;;  %475 = vmatpush.msrb.mxu3 %v951_v3 }
  0x17   :  { %786 = vmatpush.msra.mxu2 %v56_v9  ;;  %346 = vmatpush.msrb.mxu1 %v953_v4  ;;  %v48_v9 = vld [vmem:[#allocation3 + $0x10] sm:$0xff] }
  0x18   :  { %103 = vmatpush.msra.mxu0 %v55_v10  ;;  %476 = vmatpush.msrb.mxu3 %v953_v4 }
  0x19   :  { %787 = vmatpush.msra.mxu2 %v55_v10  ;;  %347 = vmatpush.msrb.mxu1 %v956_v6 }
  0x1a   :  { %104 = vmatpush.msra.mxu0 %v54_v12  ;;  %477 = vmatpush.msrb.mxu3 %v956_v6 }
  0x1b   :  { %750 = vmatmul.msk.f32.vlgmr.msra.gmra.mxu0 %vm64_vm0, %v46_v13  ;;  %788 = vmatpush.msra.mxu2 %v54_v12 }
  0x1c   :  { %348 = vmatpush.msrb.mxu1 %v960_v8  ;;  %478 = vmatpush.msrb.mxu3 %v960_v8 }
  0x1d   :  { %215 = vmatpush.msrb.mxu2 %v951_v3 }
  0x1e   :  { %540 = vmatpush.msra.mxu1 %v951_v3  ;;  %756 = vmatmul.msk.f32.vlgmr.msra.gmra.mxu2 %vm64_vm0, %v52_v39 }
  0x1f   :  { %216 = vmatpush.msrb.mxu2 %v953_v4 }
  0x20   :  { %541 = vmatpush.msra.mxu1 %v953_v4 }
  0x21   :  { %217 = vmatpush.msrb.mxu2 %v956_v6 }
  0x22   :  { %542 = vmatpush.msra.mxu1 %v956_v6 }
  0x23   :  { %218 = vmatpush.msrb.mxu2 %v960_v8  ;;  %751 = vmatmul.msk.f32.gmra.mxu0 %vm64_vm0, %v47_v43 }
  0x24   :  { %543 = vmatpush.msra.mxu1 %v960_v8 }
  0x25   :  { %410 = vmatpush.msra.mxu2 %v951_v3 }
  0x26   :  { %757 = vmatmul.msk.f32.gmra.mxu2 %vm64_vm0, %v53_v40 }
  0x27   :  { %411 = vmatpush.msra.mxu2 %v953_v4 }
  0x29   :  { %412 = vmatpush.msra.mxu2 %v956_v6 }
  0x2b   :  { %413 = vmatpush.msra.mxu2 %v960_v8  ;;  %752 = vmatmul.msk.f32.gmra.mxu0 %vm64_vm0, %v48_v9 }
  0x91   :  { %v155_v16 = vpop.f32.mrf.mxu1 }
  0x98   :  { %v106_v15 = vpop.f32.mrf.mxu0 }
  0x99   :  { %v107_v17 = vadd.f32 %v984_v14, %v106_v15 }
  0x9b   :  { %v158_v18 = vadd.f32 %v155_v16, %v107_v17 }
  0x9d   :  { %802 = vtanh.f32 %v158_v18  ;;  %v758_v20 = vmul.f32 -1.442695, %v158_v18 }
  0x9f   :  { %804 = vpow2.f32 %v758_v20 }
  0xa0   :  { %v109_v47 = vpop.f32.mrf.mxu0 }
  0xa1   :  { %v1004_v45 = vpop.f32.mrf.mxu2  ;;  %v110_v48 = vadd.f32 %v984_v14, %v109_v47 }
  0xa3   :  { %v803_v19 = vpop.eup %802 }
  0xa4   :  { %181 = vrot.lane.b32.xlu0 %v803_v19, %s923_s0 }
  0xa5   :  { %v805_v21 = vpop.eup %804 }
  0xa6   :  { %v162_v22 = vadd.f32 1.0, %v805_v21 }
  0xa8   :  { %806 = vrcp.f32 %v162_v22  ;;  %v174_v28 = vand.u32 2147483648, %v162_v22  ;;  %vm168_vm2 = vweird.f32 %v162_v22  ;;  %v172_v29 = vand.u32 2147483647, %v162_v22  ;;  %v112_v11 = vpop.f32.mrf.mxu0 }
  0xa9   :  { %v1006_v46 = vpop.f32.mrf.mxu2  ;;  %v113_v12 = vadd.f32 %v984_v14, %v112_v11 }
  0xaa   :  { %v175_v31 = vor.u32 1.1754944e-38, %v174_v28  ;;  %vm173_vm4 = vcmp.eq.f32.partialorder %v172_v29, 8.507059e+37 }
  0xae   :  { %v807_v23 = vpop.eup %806 }
  0xaf   :  { %v164_v24 = vmul.f32 %v807_v23, %v162_v22  ;;  %vm169_vm1 = vweird.f32 %v807_v23 }
  0xb0   :  { %vm170_vm3 = vmor %vm168_vm2, %vm169_vm1 }
  0xb1   :  { %v165_v25 = vsub.f32 1.0, %v164_v24 }
  0xb3   :  { %v166_v26 = vmul.f32 %v807_v23, %v165_v25 }
  0xb5   :  { %v167_v27 = vadd.f32 %v807_v23, %v166_v26 }
  0xb7   :  { %v171_v30 = vsel %vm170_vm3, %v807_v23, %v167_v27 }
  0xb8   :  { %v176_v33 = vsel %vm173_vm4, %v175_v31, %v171_v30 }
  0xb9   :  { %v179_v35 = vmul.f32 0.0, %v176_v33 }
 0x116   :  { %v182_v32 = vpop.permute.xlu0 %181 }
 0x117   :  { %v184_v34 = vmul.f32 %v182_v32, %v176_v33 }
 0x119   :  { %186 = vrot.lane.b32.xlu0 %v184_v34, %s924_s1 }
 0x18b   :  { %v187_v36 = vpop.permute.xlu0 %186 }
 0x18c   :  { %v189_v37 = vadd.f32 %v187_v36, %v179_v35  ;;  %v49_v36 = vld [vmem:[#allocation3 + $0x18] sm:$0xff] }
 0x18d   :  { %753 = vmatmul.msk.f32.gmra.mxu0 %vm64_vm0, %v49_v36  ;;  %v665_v36 = vld [vmem:[%s1133_s2 + $0x8] sm:$0xff] }
 0x18e   :  { %808 = vtanh.f32 %v189_v37 }
 0x194   :  { %v809_v38 = vpop.eup %808 }
 0x195   :  { %192 = vrot.lane.b32.xlu1 %v809_v38, %s923_s0 }
 0x207   :  { %v193_v41 = vpop.permute.xlu1 %192 }
 0x208   :  { %v195_v42 = vmul.f32 %v193_v41, %v176_v33 }
 0x20a   :  { %197 = vrot.lane.b32.xlu1 %v195_v42, %s924_s1  ;;  %v115_v40 = vpop.f32.mrf.mxu0 }
 0x20b   :  { %v116_v41 = vadd.f32 %v984_v14, %v115_v40 }
 0x27c   :  { %v198_v44 = vpop.permute.xlu1 %197 }
 0x27d   :  { %200 = vst.msk [vmem:[#allocation2] sm:$0xff] %vm134_vm5, %v198_v44  ;;  %759 = vmatmul.msk.f32.vlgmr.msrb.gmra.mxu2 %vm134_vm5, %v198_v44 }
 0x27e   :  { %605 = vmatpush.msrb.mxu2 %v951_v3 }
 0x280   :  { %606 = vmatpush.msrb.mxu2 %v953_v4 }
 0x282   :  { %607 = vmatpush.msrb.mxu2 %v956_v6 }
 0x284   :  { %608 = vmatpush.msrb.mxu2 %v960_v8 }
 0x300   :  { %v220_v49 = vpop.f32.mrf.mxu2 }
 0x301   :  { %v223_v50 = vadd.f32 %v220_v49, %v110_v48 }
 0x303   :  { %810 = vtanh.f32 %v223_v50  ;;  %v760_v52 = vmul.f32 -1.442695, %v223_v50 }
 0x305   :  { %812 = vpow2.f32 %v760_v52 }
 0x309   :  { %v811_v51 = vpop.eup %810 }
 0x30a   :  { %246 = vrot.lane.b32.xlu2 %v811_v51, %s923_s0 }
 0x30b   :  { %v813_v53 = vpop.eup %812 }
 0x30c   :  { %v227_v54 = vadd.f32 1.0, %v813_v53 }
 0x30e   :  { %814 = vrcp.f32 %v227_v54  ;;  %v239_v60 = vand.u32 2147483648, %v227_v54  ;;  %vm233_vm7 = vweird.f32 %v227_v54  ;;  %v237_v61 = vand.u32 2147483647, %v227_v54 }
 0x310   :  { %v240_v63 = vor.u32 1.1754944e-38, %v239_v60  ;;  %vm238_vm9 = vcmp.eq.f32.partialorder %v237_v61, 8.507059e+37 }
 0x314   :  { %v815_v55 = vpop.eup %814 }
 0x315   :  { %v229_v56 = vmul.f32 %v815_v55, %v227_v54  ;;  %vm234_vm6 = vweird.f32 %v815_v55 }
 0x316   :  { %vm235_vm8 = vmor %vm233_vm7, %vm234_vm6 }
 0x317   :  { %v230_v57 = vsub.f32 1.0, %v229_v56 }
 0x319   :  { %v231_v58 = vmul.f32 %v815_v55, %v230_v57 }
 0x31b   :  { %v232_v59 = vadd.f32 %v815_v55, %v231_v58 }
 0x31d   :  { %v236_v62 = vsel %vm235_vm8, %v815_v55, %v232_v59 }
 0x31e   :  { %v241_v1 = vsel %vm238_vm9, %v240_v63, %v236_v62 }
 0x31f   :  { %v244_v3 = vmul.f32 %v241_v1, %v189_v37 }
 0x364   :  { %v247_v0 = vpop.permute.xlu2 %246 }
 0x365   :  { %v249_v2 = vmul.f32 %v247_v0, %v241_v1 }
 0x367   :  { %251 = vrot.lane.b32.xlu2 %v249_v2, %s924_s1 }
 0x3c1   :  { %v252_v4 = vpop.permute.xlu2 %251 }
 0x3c2   :  { %v254_v5 = vadd.f32 %v252_v4, %v244_v3  ;;  %v50_v4 = vld [vmem:[#allocation3 + $0x20] sm:$0xff] }
 0x3c3   :  { %754 = vmatmul.msk.f32.gmra.mxu0 %vm64_vm0, %v50_v4 }
 0x3c4   :  { %816 = vtanh.f32 %v254_v5 }
 0x3ca   :  { %v817_v6 = vpop.eup %816 }
 0x3cb   :  { %257 = vrot.lane.b32.xlu0 %v817_v6, %s923_s0 }
 0x43d   :  { %v258_v7 = vpop.permute.xlu0 %257 }
 0x43e   :  { %v260_v8 = vmul.f32 %v258_v7, %v241_v1 }
 0x440   :  { %262 = vrot.lane.b32.xlu1 %v260_v8, %s924_s1  ;;  %v118_v6 = vpop.f32.mrf.mxu0 }
 0x441   :  { %v119_v7 = vadd.f32 %v984_v14, %v118_v6 }
 0x4b2   :  { %v263_v10 = vpop.permute.xlu1 %262 }
 0x4b3   :  { %265 = vst.msk [vmem:[#allocation2 + $0x8] sm:$0xff] %vm134_vm5, %v263_v10  ;;  %761 = vmatmul.msk.f32.vlgmr.msra.gmra.mxu3 %vm134_vm5, %v263_v10 }
 0x536   :  { %v285_v13 = vpop.f32.mrf.mxu3 }
 0x537   :  { %v288_v15 = vadd.f32 %v285_v13, %v113_v12 }
 0x539   :  { %818 = vtanh.f32 %v288_v15  ;;  %v762_v17 = vmul.f32 -1.442695, %v288_v15 }
 0x53b   :  { %820 = vpow2.f32 %v762_v17 }
 0x53f   :  { %v819_v16 = vpop.eup %818 }
 0x540   :  { %311 = vrot.lane.b32.xlu2 %v819_v16, %s923_s0 }
 0x541   :  { %v821_v18 = vpop.eup %820 }
 0x542   :  { %v292_v19 = vadd.f32 1.0, %v821_v18 }
 0x544   :  { %822 = vrcp.f32 %v292_v19  ;;  %v304_v25 = vand.u32 2147483648, %v292_v19  ;;  %vm298_vm11 = vweird.f32 %v292_v19  ;;  %v302_v26 = vand.u32 2147483647, %v292_v19 }
 0x546   :  { %v305_v28 = vor.u32 1.1754944e-38, %v304_v25  ;;  %vm303_vm13 = vcmp.eq.f32.partialorder %v302_v26, 8.507059e+37 }
 0x54a   :  { %v823_v20 = vpop.eup %822 }
 0x54b   :  { %v294_v21 = vmul.f32 %v823_v20, %v292_v19  ;;  %vm299_vm10 = vweird.f32 %v823_v20 }
 0x54c   :  { %vm300_vm12 = vmor %vm298_vm11, %vm299_vm10 }
 0x54d   :  { %v295_v22 = vsub.f32 1.0, %v294_v21 }
 0x54f   :  { %v296_v23 = vmul.f32 %v823_v20, %v295_v22 }
 0x551   :  { %v297_v24 = vadd.f32 %v823_v20, %v296_v23 }
 0x553   :  { %v301_v27 = vsel %vm300_vm12, %v823_v20, %v297_v24 }
 0x554   :  { %v306_v30 = vsel %vm303_vm13, %v305_v28, %v301_v27 }
 0x555   :  { %v309_v32 = vmul.f32 %v306_v30, %v254_v5 }
 0x59a   :  { %v312_v29 = vpop.permute.xlu2 %311 }
 0x59b   :  { %v314_v31 = vmul.f32 %v312_v29, %v306_v30 }
 0x59d   :  { %316 = vrot.lane.b32.xlu0 %v314_v31, %s924_s1 }
 0x60f   :  { %v317_v33 = vpop.permute.xlu0 %316 }
 0x610   :  { %v319_v34 = vadd.f32 %v317_v33, %v309_v32  ;;  %v667_v33 = vld [vmem:[%s1133_s2 + $0x18] sm:$0xff] }
 0x611   :  { %789 = vmatpush.msra.mxu3 %v667_v33 }
 0x612   :  { %824 = vtanh.f32 %v319_v34 }
 0x618   :  { %v825_v35 = vpop.eup %824 }
 0x619   :  { %322 = vrot.lane.b32.xlu1 %v825_v35, %s923_s0  ;;  %v51_v35 = vld [vmem:[#allocation3 + $0x28] sm:$0xff] }
 0x61a   :  { %755 = vmatmul.msk.f32.gmra.mxu0 %vm64_vm0, %v51_v35  ;;  %vm735_vm0 = vcmask 130048  }
 0x68b   :  { %v323_v37 = vpop.permute.xlu1 %322 }
 0x68c   :  { %v325_v38 = vmul.f32 %v323_v37, %v306_v30  ;;  %v664_v37 = vld [vmem:[%s1133_s2] sm:$0xff] }
 0x68e   :  { %327 = vrot.lane.b32.xlu2 %v325_v38, %s924_s1 }
 0x6e8   :  { %v328_v39 = vpop.permute.xlu2 %327 }
 0x6e9   :  { %330 = vst.msk [vmem:[#allocation2 + $0x10] sm:$0xff] %vm134_vm5, %v328_v39  ;;  %763 = vmatmul.msk.f32.vlgmr.msrb.gmra.mxu1 %vm134_vm5, %v328_v39 }
 0x6ea   :  { %706 = vmatpush.msrb.mxu1 %v667_v33 }
 0x766   :  { %v350_v42 = vpop.f32.mrf.mxu1 }
 0x767   :  { %v353_v43 = vadd.f32 %v350_v42, %v116_v41  ;;  %v121_v41 = vpop.f32.mrf.mxu0 }
 0x768   :  { %v122_v42 = vadd.f32 %v984_v14, %v121_v41 }
 0x769   :  { %826 = vtanh.f32 %v353_v43  ;;  %v764_v47 = vmul.f32 -1.442695, %v353_v43 }
 0x76b   :  { %828 = vpow2.f32 %v764_v47  ;;  %v1061_v47 = vld [vmem:[%s1133_s2 + $0x20] ss:$0 sm:$0xff] }
 0x76f   :  { %v827_v44 = vpop.eup %826 }
 0x770   :  { %376 = vrot.lane.b32.xlu0 %v827_v44, %s923_s0 }
 0x771   :  { %v829_v48 = vpop.eup %828 }
 0x772   :  { %v357_v49 = vadd.f32 1.0, %v829_v48 }
 0x774   :  { %830 = vrcp.f32 %v357_v49  ;;  %v369_v55 = vand.u32 2147483648, %v357_v49  ;;  %vm363_vm15 = vweird.f32 %v357_v49  ;;  %v367_v56 = vand.u32 2147483647, %v357_v49 }
 0x776   :  { %v370_v58 = vor.u32 1.1754944e-38, %v369_v55  ;;  %vm368_vm2 = vcmp.eq.f32.partialorder %v367_v56, 8.507059e+37 }
 0x77a   :  { %v831_v50 = vpop.eup %830 }
 0x77b   :  { %v359_v51 = vmul.f32 %v831_v50, %v357_v49  ;;  %vm364_vm14 = vweird.f32 %v831_v50 }
 0x77c   :  { %vm365_vm1 = vmor %vm363_vm15, %vm364_vm14 }
 0x77d   :  { %v360_v52 = vsub.f32 1.0, %v359_v51 }
 0x77f   :  { %v361_v53 = vmul.f32 %v831_v50, %v360_v52 }
 0x781   :  { %v362_v54 = vadd.f32 %v831_v50, %v361_v53 }
 0x783   :  { %v366_v57 = vsel %vm365_vm1, %v831_v50, %v362_v54 }
 0x784   :  { %v371_v60 = vsel %vm368_vm2, %v370_v58, %v366_v57 }
 0x785   :  { %v374_v62 = vmul.f32 %v371_v60, %v319_v34  ;;  %v666_v34 = vld [vmem:[%s1133_s2 + $0x10] sm:$0xff] }
 0x786   :  { %790 = vmatpush.msra.mxu3 %v666_v34  ;;  %707 = vmatpush.msrb.mxu1 %v666_v34 }
 0x788   :  { %791 = vmatpush.msra.mxu3 %v665_v36  ;;  %708 = vmatpush.msrb.mxu1 %v665_v36 }
 0x78a   :  { %792 = vmatpush.msra.mxu3 %v664_v37  ;;  %709 = vmatpush.msrb.mxu1 %v664_v37 }
 0x7e2   :  { %v377_v59 = vpop.permute.xlu0 %376 }
 0x7e3   :  { %v379_v61 = vmul.f32 %v377_v59, %v371_v60 }
 0x7e5   :  { %381 = vrot.lane.b32.xlu1 %v379_v61, %s924_s1 }
 0x857   :  { %v382_v63 = vpop.permute.xlu1 %381 }
 0x858   :  { %v384_v0 = vadd.f32 %v382_v63, %v374_v62 }
 0x85a   :  { %832 = vtanh.f32 %v384_v0 }
 0x860   :  { %v833_v1 = vpop.eup %832 }
 0x861   :  { %387 = vrot.lane.b32.xlu2 %v833_v1, %s923_s0 }
 0x8bb   :  { %v388_v2 = vpop.permute.xlu2 %387 }
 0x8bc   :  { %v390_v3 = vmul.f32 %v388_v2, %v371_v60 }
 0x8be   :  { %392 = vrot.lane.b32.xlu0 %v390_v3, %s924_s1 }
 0x930   :  { %v393_v5 = vpop.permute.xlu0 %392 }
 0x931   :  { %395 = vst.msk [vmem:[#allocation2 + $0x18] sm:$0xff] %vm134_vm5, %v393_v5  ;;  %765 = vmatmul.msk.f32.vlgmr.msra.gmra.mxu2 %vm134_vm5, %v393_v5 }
 0x938   :  { %v659_v39 = vld [vmem:[#allocation2 + $0x18] sm:$0xff] }
 0x9b4   :  { %v415_v8 = vpop.f32.mrf.mxu2 }
 0x9b5   :  { %v418_v9 = vadd.f32 %v415_v8, %v119_v7 }
 0x9b7   :  { %834 = vtanh.f32 %v418_v9  ;;  %v766_v11 = vmul.f32 -1.442695, %v418_v9 }
 0x9b9   :  { %836 = vpow2.f32 %v766_v11  ;;  %v656_v11 = vld [vmem:[#allocation2] sm:$0xff] }
 0x9bd   :  { %v835_v10 = vpop.eup %834 }
 0x9be   :  { %441 = vrot.lane.b32.xlu1 %v835_v10, %s923_s0 }
 0x9bf   :  { %v837_v12 = vpop.eup %836 }
 0x9c0   :  { %v422_v13 = vadd.f32 1.0, %v837_v12 }
 0x9c2   :  { %838 = vrcp.f32 %v422_v13  ;;  %v434_v20 = vand.u32 2147483648, %v422_v13  ;;  %vm428_vm4 = vweird.f32 %v422_v13  ;;  %v432_v21 = vand.u32 2147483647, %v422_v13 }
 0x9c4   :  { %v435_v23 = vor.u32 1.1754944e-38, %v434_v20  ;;  %vm433_vm7 = vcmp.eq.f32.partialorder %v432_v21, 8.507059e+37 }
 0x9c8   :  { %v839_v15 = vpop.eup %838 }
 0x9c9   :  { %v424_v16 = vmul.f32 %v839_v15, %v422_v13  ;;  %vm429_vm3 = vweird.f32 %v839_v15  ;;  %v657_v13 = vld [vmem:[#allocation2 + $0x8] sm:$0xff] }
 0x9ca   :  { %vm430_vm6 = vmor %vm428_vm4, %vm429_vm3 }
 0x9cb   :  { %v425_v17 = vsub.f32 1.0, %v424_v16  ;;  %v125_v16 = vadd.f32 %v984_v14, %v1004_v45 }
 0x9cd   :  { %v426_v18 = vmul.f32 %v839_v15, %v425_v17 }
 0x9cf   :  { %v427_v19 = vadd.f32 %v839_v15, %v426_v18 }
 0x9d1   :  { %v431_v22 = vsel %vm430_vm6, %v839_v15, %v427_v19  ;;  %v658_v15 = vld [vmem:[#allocation2 + $0x10] sm:$0xff] }
 0x9d2   :  { %v436_v25 = vsel %vm433_vm7, %v435_v23, %v431_v22 }
 0x9d3   :  { %v439_v27 = vmul.f32 %v436_v25, %v384_v0 }
 0xa30   :  { %v442_v24 = vpop.permute.xlu1 %441 }
 0xa31   :  { %v444_v26 = vmul.f32 %v442_v24, %v436_v25 }
 0xa33   :  { %446 = vrot.lane.b32.xlu2 %v444_v26, %s924_s1 }
 0xa8d   :  { %v447_v28 = vpop.permute.xlu2 %446 }
 0xa8e   :  { %v1035_v29 = vadd.f32 %v447_v28, %v439_v27 }
 0xa90   :  { %840 = vtanh.f32 %v1035_v29 }
 0xa96   :  { %v841_v30 = vpop.eup %840 }
 0xa97   :  { %452 = vrot.lane.b32.xlu0 %v841_v30, %s923_s0 }
 0xb09   :  { %v453_v31 = vpop.permute.xlu0 %452 }
 0xb0a   :  { %v455_v32 = vmul.f32 %v453_v31, %v436_v25 }
 0xb0c   :  { %457 = vrot.lane.b32.xlu1 %v455_v32, %s924_s1 }
 0xb7e   :  { %v458_v38 = vpop.permute.xlu1 %457 }
 0xb7f   :  { %460 = vst.msk [vmem:[#allocation2 + $0x20] sm:$0xff] %vm134_vm5, %v458_v38  ;;  %767 = vmatmul.msk.f32.vlgmr.msrb.gmra.mxu3 %vm134_vm5, %v458_v38 }
 0xb86   :  { %v660_v40 = vld [vmem:[#allocation2 + $0x20] sm:$0xff] }
 0xb87   :  { %776 = vmatmul.msk.f32.vlgmr.msra.gmra.mxu3 %vm134_vm5, %v659_v39 }
 0xb8f   :  { %777 = vmatmul.msk.f32.gmra.mxu3 %vm134_vm5, %v660_v40 }
 0xc02   :  { %v480_v43 = vpop.f32.mrf.mxu3 }
 0xc03   :  { %v483_v44 = vadd.f32 %v480_v43, %v122_v42 }
 0xc05   :  { %842 = vtanh.f32 %v483_v44  ;;  %v768_v53 = vmul.f32 -1.442695, %v483_v44 }
 0xc07   :  { %844 = vpow2.f32 %v768_v53  ;;  %v128_v53 = vadd.f32 %v984_v14, %v1006_v46 }
 0xc0a   :  { %v720_v48 = vpop.f32.mrf.mxu3 }
 0xc0b   :  { %v843_v49 = vpop.eup %842  ;;  %v721_v50 = vadd.f32 %v1061_v47, %v720_v48 }
 0xc0c   :  { %506 = vrot.lane.b32.xlu2 %v843_v49, %s923_s0 }
 0xc0d   :  { %739 = vst.msk [vmem:[%s1134_s3 + $0x18] sm:$0xff] %vm735_vm0, %v721_v50  ;;  %v845_v54 = vpop.eup %844 }
 0xc0e   :  { %v487_v55 = vadd.f32 1.0, %v845_v54 }
 0xc10   :  { %846 = vrcp.f32 %v487_v55  ;;  %v499_v61 = vand.u32 2147483648, %v487_v55  ;;  %vm493_vm9 = vweird.f32 %v487_v55  ;;  %v497_v62 = vand.u32 2147483647, %v487_v55 }
 0xc12   :  { %v723_v51 = vpop.f32.mrf.mxu3  ;;  %v500_v0 = vor.u32 1.1754944e-38, %v499_v61  ;;  %vm498_vm11 = vcmp.eq.f32.partialorder %v497_v62, 8.507059e+37 }
 0xc13   :  { %v724_v52 = vadd.f32 %v1061_v47, %v723_v51 }
 0xc15   :  { %740 = vst.msk [vmem:[%s1134_s3 + $0x20] sm:$0xff] %vm735_vm0, %v724_v52 }
 0xc16   :  { %v847_v56 = vpop.eup %846 }
 0xc17   :  { %v489_v57 = vmul.f32 %v847_v56, %v487_v55  ;;  %vm494_vm8 = vweird.f32 %v847_v56 }
 0xc18   :  { %vm495_vm10 = vmor %vm493_vm9, %vm494_vm8 }
 0xc19   :  { %v490_v58 = vsub.f32 1.0, %v489_v57 }
 0xc1b   :  { %v491_v59 = vmul.f32 %v847_v56, %v490_v58 }
 0xc1d   :  { %v492_v60 = vadd.f32 %v847_v56, %v491_v59 }
 0xc1f   :  { %v496_v63 = vsel %vm495_vm10, %v847_v56, %v492_v60 }
 0xc20   :  { %v501_v2 = vsel %vm498_vm11, %v500_v0, %v496_v63 }
 0xc21   :  { %v504_v4 = vmul.f32 %v501_v2, %v1035_v29 }
 0xc66   :  { %v507_v1 = vpop.permute.xlu2 %506 }
 0xc67   :  { %v509_v3 = vmul.f32 %v507_v1, %v501_v2 }
 0xc69   :  { %511 = vrot.lane.b32.xlu0 %v509_v3, %s924_s1 }
 0xcdb   :  { %v512_v5 = vpop.permute.xlu0 %511 }
 0xcdc   :  { %v514_v6 = vadd.f32 %v512_v5, %v504_v4 }
 0xcde   :  { %848 = vtanh.f32 %v514_v6 }
 0xce4   :  { %v849_v7 = vpop.eup %848 }
 0xce5   :  { %517 = vrot.lane.b32.xlu1 %v849_v7, %s923_s0 }
 0xd57   :  { %v518_v8 = vpop.permute.xlu1 %517 }
 0xd58   :  { %v520_v9 = vmul.f32 %v518_v8, %v501_v2 }
 0xd5a   :  { %522 = vrot.lane.b32.xlu2 %v520_v9, %s924_s1 }
 0xdb4   :  { %v523_v10 = vpop.permute.xlu2 %522 }
 0xdb5   :  { %525 = vst.msk [vmem:[#allocation2 + $0x28] sm:$0xff] %vm134_vm5, %v523_v10  ;;  %769 = vmatmul.msk.f32.vlgmr.msra.gmra.mxu1 %vm134_vm5, %v523_v10 }
 0xdbc   :  { %v661_v12 = vld [vmem:[#allocation2 + $0x28] sm:$0xff] }
 0xdbd   :  { %773 = vmatmul.msk.f32.vlgmr.msrb.gmra.mxu1 %vm134_vm5, %v656_v11  ;;  %778 = vmatmul.msk.f32.gmra.mxu3 %vm134_vm5, %v661_v12 }
 0xdc5   :  { %774 = vmatmul.msk.f32.gmra.mxu1 %vm134_vm5, %v657_v13 }
 0xdcd   :  { %775 = vmatmul.msk.f32.gmra.mxu1 %vm134_vm5, %v658_v15 }
 0xe32   :  { %v545_v17 = vpop.f32.mrf.mxu1 }
 0xe33   :  { %v548_v18 = vadd.f32 %v545_v17, %v125_v16 }
 0xe35   :  { %850 = vtanh.f32 %v548_v18  ;;  %v770_v27 = vmul.f32 -1.442695, %v548_v18 }
 0xe37   :  { %852 = vpow2.f32 %v770_v27 }
 0xe3a   :  { %v711_v19 = vpop.f32.mrf.mxu1 }
 0xe3b   :  { %v851_v20 = vpop.eup %850  ;;  %v712_v21 = vadd.f32 %v1061_v47, %v711_v19 }
 0xe3c   :  { %571 = vrot.lane.b32.xlu0 %v851_v20, %s923_s0 }
 0xe3d   :  { %736 = vst.msk [vmem:[%s1134_s3] sm:$0xff] %vm735_vm0, %v712_v21  ;;  %v853_v28 = vpop.eup %852 }
 0xe3e   :  { %v552_v29 = vadd.f32 1.0, %v853_v28 }
 0xe40   :  { %v726_v22 = vpop.f32.mrf.mxu3  ;;  %854 = vrcp.f32 %v552_v29  ;;  %v564_v35 = vand.u32 2147483648, %v552_v29  ;;  %vm558_vm13 = vweird.f32 %v552_v29  ;;  %v562_v36 = vand.u32 2147483647, %v552_v29 }
 0xe41   :  { %v727_v23 = vadd.f32 %v1061_v47, %v726_v22 }
 0xe42   :  { %v714_v24 = vpop.f32.mrf.mxu1  ;;  %v565_v38 = vor.u32 1.1754944e-38, %v564_v35  ;;  %vm563_vm15 = vcmp.eq.f32.partialorder %v562_v36, 8.507059e+37 }
 0xe43   :  { %741 = vst.msk [vmem:[%s1134_s3 + $0x28] sm:$0xff] %vm735_vm0, %v727_v23  ;;  %v715_v45 = vadd.f32 %v1061_v47, %v714_v24 }
 0xe45   :  { %737 = vst.msk [vmem:[%s1134_s3 + $0x8] sm:$0xff] %vm735_vm0, %v715_v45 }
 0xe46   :  { %v855_v30 = vpop.eup %854 }
 0xe47   :  { %v554_v31 = vmul.f32 %v855_v30, %v552_v29  ;;  %vm559_vm12 = vweird.f32 %v855_v30 }
 0xe48   :  { %vm560_vm14 = vmor %vm558_vm13, %vm559_vm12 }
 0xe49   :  { %v555_v32 = vsub.f32 1.0, %v554_v31 }
 0xe4a   :  { %v717_v25 = vpop.f32.mrf.mxu1 }
 0xe4b   :  { %v718_v26 = vadd.f32 %v1061_v47, %v717_v25  ;;  %v556_v33 = vmul.f32 %v855_v30, %v555_v32 }
 0xe4d   :  { %738 = vst.msk [vmem:[%s1134_s3 + $0x10] sm:$0xff] %vm735_vm0, %v718_v26  ;;  %v557_v34 = vadd.f32 %v855_v30, %v556_v33 }
 0xe4f   :  { %v561_v37 = vsel %vm560_vm14, %v855_v30, %v557_v34 }
 0xe50   :  { %v566_v40 = vsel %vm563_vm15, %v565_v38, %v561_v37 }
 0xe51   :  { %v569_v42 = vmul.f32 %v566_v40, %v514_v6 }
 0xeae   :  { %v572_v39 = vpop.permute.xlu0 %571 }
 0xeaf   :  { %v574_v41 = vmul.f32 %v572_v39, %v566_v40 }
 0xeb1   :  { %576 = vrot.lane.b32.xlu1 %v574_v41, %s924_s1 }
 0xf23   :  { %v577_v43 = vpop.permute.xlu1 %576 }
 0xf24   :  { %v579_v44 = vadd.f32 %v577_v43, %v569_v42 }
 0xf26   :  { %856 = vtanh.f32 %v579_v44 }
 0xf2c   :  { %v857_v48 = vpop.eup %856 }
 0xf2d   :  { %582 = vrot.lane.b32.xlu2 %v857_v48, %s923_s0 }
 0xf87   :  { %v583_v49 = vpop.permute.xlu2 %582 }
 0xf88   :  { %v585_v50 = vmul.f32 %v583_v49, %v566_v40 }
 0xf8a   :  { %587 = vrot.lane.b32.xlu0 %v585_v50, %s924_s1 }
 0xffc   :  { %v588_v51 = vpop.permute.xlu0 %587 }
 0xffd   :  { %590 = vst.msk [vmem:[#allocation2 + $0x30] sm:$0xff] %vm134_vm5, %v588_v51  ;;  %771 = vmatmul.msk.f32.vlgmr.msrb.gmra.mxu2 %vm134_vm5, %v588_v51 }
0x1004   :  { %v662_v52 = vld [vmem:[#allocation2 + $0x30] sm:$0xff] }
0x1005   :  { %779 = vmatmul.msk.f32.gmra.mxu3 %vm134_vm5, %v662_v52 }
0x1080   :  { %v610_v54 = vpop.f32.mrf.mxu2 }
0x1081   :  { %v613_v55 = vadd.f32 %v610_v54, %v128_v53 }
0x1083   :  { %858 = vtanh.f32 %v613_v55  ;;  %v772_v59 = vmul.f32 -1.442695, %v613_v55 }
0x1085   :  { %860 = vpow2.f32 %v772_v59 }
0x1088   :  { %v729_v56 = vpop.f32.mrf.mxu3 }
0x1089   :  { %v859_v57 = vpop.eup %858  ;;  %v730_v58 = vadd.f32 %v1061_v47, %v729_v56 }
0x108a   :  { %636 = vrot.lane.b32.xlu1 %v859_v57, %s923_s0 }
0x108b   :  { %742 = vst.msk [vmem:[%s1134_s3 + $0x30] sm:$0xff] %vm735_vm0, %v730_v58  ;;  %v861_v60 = vpop.eup %860 }
0x108c   :  { %v617_v61 = vadd.f32 1.0, %v861_v60 }
0x108e   :  { %862 = vrcp.f32 %v617_v61  ;;  %v629_v1 = vand.u32 2147483648, %v617_v61  ;;  %vm623_vm2 = vweird.f32 %v617_v61  ;;  %v627_v2 = vand.u32 2147483647, %v617_v61 }
0x1090   :  { %v630_v4 = vor.u32 1.1754944e-38, %v629_v1  ;;  %vm628_vm4 = vcmp.eq.f32.partialorder %v627_v2, 8.507059e+37 }
0x1094   :  { %v863_v14 = vpop.eup %862 }
0x1095   :  { %v619_v46 = vmul.f32 %v863_v14, %v617_v61  ;;  %vm624_vm1 = vweird.f32 %v863_v14 }
0x1096   :  { %vm625_vm3 = vmor %vm623_vm2, %vm624_vm1 }
0x1097   :  { %v620_v62 = vsub.f32 1.0, %v619_v46 }
0x1099   :  { %v621_v63 = vmul.f32 %v863_v14, %v620_v62 }
0x109b   :  { %v622_v0 = vadd.f32 %v863_v14, %v621_v63 }
0x109d   :  { %v626_v3 = vsel %vm625_vm3, %v863_v14, %v622_v0 }
0x109e   :  { %v631_v6 = vsel %vm628_vm4, %v630_v4, %v626_v3 }
0x109f   :  { %v634_v8 = vmul.f32 %v631_v6, %v579_v44 }
0x10fc   :  { %v637_v5 = vpop.permute.xlu1 %636 }
0x10fd   :  { %v639_v7 = vmul.f32 %v637_v5, %v631_v6 }
0x10ff   :  { %641 = vrot.lane.b32.xlu2 %v639_v7, %s924_s1 }
0x1159   :  { %v642_v9 = vpop.permute.xlu2 %641 }
0x115a   :  { %v644_v10 = vadd.f32 %v642_v9, %v634_v8 }
0x115c   :  { %864 = vtanh.f32 %v644_v10 }
0x1162   :  { %v865_v11 = vpop.eup %864 }
0x1163   :  { %647 = vrot.lane.b32.xlu0 %v865_v11, %s923_s0 }
0x11d5   :  { %v648_v12 = vpop.permute.xlu0 %647 }
0x11d6   :  { %v650_v13 = vmul.f32 %v648_v12, %v631_v6 }
0x11d8   :  { %652 = vrot.lane.b32.xlu1 %v650_v13, %s924_s1 }
0x124a   :  { %v653_v15 = vpop.permute.xlu1 %652 }
0x124b   :  { %655 = vst.msk [vmem:[#allocation2 + $0x38] sm:$0xff] %vm134_vm5, %v653_v15 }
0x1252   :  { %v663_v16 = vld [vmem:[#allocation2 + $0x38] sm:$0xff] }
0x1253   :  { %780 = vmatmul.msk.f32.gmra.mxu3 %vm134_vm5, %v663_v16 }
0x12d6   :  { %v732_v17 = vpop.f32.mrf.mxu3 }
0x12d7   :  { %v733_v18 = vadd.f32 %v1061_v47, %v732_v17 }
0x12d9   :  { %743 = vst.msk [vmem:[%s1134_s3 + $0x38] sm:$0xff] %vm735_vm0, %v733_v18 }
0x12da   :  { %748 = vsyncpa [#allocation4], 1 }
0x12db   :  { %749 = vsyncpa [#allocation6], 1 }

</bundles_post_ra>
